<compile_context>
chip_gen: v7x
topology: tpu7x:2x2x1
jax: 0.10.0
libtpu: 0.0.40
codegen_flags: <defaults>
</compile_context>

<pallas_src>
import functools

import jax
import jax.numpy as jnp
from jax.experimental import pallas as pl
from jax.experimental.pallas import tpu as pltpu

_LANES = 128
_SUBLANES = 8
_PAD_NEG = -1e30  # padded elements contribute exactly 0 to every accumulator


def _round_up(x, m):
    return ((x + m - 1) // m) * m


def _pack_lane_dense(arrs_1d, n, *, pad_value, tile_m_max=4096, max_splits=2):
    """Pad 1-D length-n f32 arrays with `pad_value` and reshape lane-dense to
    (m_pad, 128), with m_pad = n_splits * tiles_per_split * tile_m (tile_m % 8 == 0).

    `pad_value` is chosen so padded elements contribute exactly 0 in the kernels,
    hence no validity mask is needed (extra padded tiles are also harmless)."""
    m = max(1, pl.cdiv(n, _LANES))
    num_tiles = pl.cdiv(m, tile_m_max)
    n_splits = max_splits if num_tiles >= max_splits else 1
    num_tiles = _round_up(num_tiles, n_splits)
    tiles_per_split = num_tiles // n_splits
    tile_m = _round_up(pl.cdiv(m, num_tiles), _SUBLANES)
    m_pad = num_tiles * tile_m
    total = m_pad * _LANES
    packed = [
        jnp.pad(a, (0, total - n), constant_values=pad_value).reshape(m_pad, _LANES)
        for a in arrs_1d
    ]
    return packed, n_splits, tiles_per_split, tile_m


# --------------------------- 2-class cross entropy ---------------------------

def _ce2_kernel(t_ref, out_ref):
    # out_ref: (8,128) per-split lane accumulator (output block revisited over j)
    @pl.when(pl.program_id(1) == 0)
    def _():
        out_ref[...] = jnp.zeros_like(out_ref)

    t = t_ref[...]                                    # (tile_m, 128), t = (1-2y)*d
    # stable softplus; padded t = -1e30 -> exactly 0
    nll = jnp.maximum(t, 0.0) + jnp.log(1.0 + jnp.exp(-jnp.abs(t)))
    tm = t_ref.shape[0]
    # group sublane rows in 8s and reduce across vregs (VPU adds, no XLU reduce)
    out_ref[...] += jnp.sum(nll.reshape(tm // _SUBLANES, _SUBLANES, _LANES), axis=0)


def cross_entropy_2class_pallas(logits, labels, *, tile_m_max=4096):
    """Mean 2-class cross-entropy: logits (..., 2), labels (...,) int -> scalar."""
    logits2d = logits.reshape(-1, logits.shape[-1])
    assert logits2d.shape[-1] == 2, "this kernel specializes the 2-class case"
    n = logits2d.shape[0]
    d = logits2d[:, 1].astype(jnp.float32) - logits2d[:, 0].astype(jnp.float32)
    # Fold the label into the logit difference: NLL = softplus((1-2y) * d).
    # TODO(synk): this deinterleave/fold could be moved in-kernel (pltpu.roll +
    # lane-parity select on lane-dense (rows,128) logits) to cut one HBM round trip.
    t = d * (1.0 - 2.0 * labels.reshape(-1).astype(jnp.float32))
    (t_p,), n_splits, tiles_per_split, tile_m = _pack_lane_dense(
        [t], n, pad_value=_PAD_NEG, tile_m_max=tile_m_max)

    out = pl.pallas_call(
        _ce2_kernel,
        out_shape=jax.ShapeDtypeStruct((n_splits, _SUBLANES, _LANES), jnp.float32),
        grid=(n_splits, tiles_per_split),
        in_specs=[pl.BlockSpec((tile_m, _LANES),
                               lambda c, j: (c * tiles_per_split + j, 0))],
        out_specs=pl.BlockSpec((None, _SUBLANES, _LANES), lambda c, j: (c, 0, 0)),
        compiler_params=pltpu.CompilerParams(
            dimension_semantics=("parallel", "arbitrary"),
            vmem_limit_bytes=32 * 1024 * 1024),
    )(t_p)
    return jnp.sum(out) / n


# ------------------ entropy / mutual-information statistics ------------------

def _mi_stats_kernel(d_ref, h_out_ref, p_out_ref):
    @pl.when(pl.program_id(1) == 0)
    def _():
        h_out_ref[...] = jnp.zeros_like(h_out_ref)
        p_out_ref[...] = jnp.zeros_like(p_out_ref)

    d = d_ref[...]                                    # (tile_m, 128), d = x1 - x0
    a = jnp.abs(d)
    e = jnp.exp(-a)                                   # EUP #1
    s = 1.0 + e
    e_over_s = e * pl.reciprocal(s, approx=True)      # EUP approx slot (near free)
    h = jnp.log(s) + a * e_over_s                     # EUP #2; entropy of softmax
    p1 = jnp.where(d >= 0.0, 1.0 - e_over_s, e_over_s)
    # padded d = -1e30: e = 0, s = 1 -> h = 0, p1 = 0 (no mask needed)

    tm = d_ref.shape[0]
    h_out_ref[...] += jnp.sum(h.reshape(tm // _SUBLANES, _SUBLANES, _LANES), axis=0)
    p_out_ref[...] += jnp.sum(p1.reshape(tm // _SUBLANES, _SUBLANES, _LANES), axis=0)


def neg_mutual_information_pallas(logits, mi_threshold, *, tile_m_max=4096):
    """Returns (entropy_loss, y_entropy) for 2-class logits (N, 2)."""
    logits2d = logits.reshape(-1, logits.shape[-1])
    assert logits2d.shape[-1] == 2, "this kernel specializes the 2-class case"
    n = logits2d.shape[0]
    d = logits2d[:, 1].astype(jnp.float32) - logits2d[:, 0].astype(jnp.float32)
    (d_p,), n_splits, tiles_per_split, tile_m = _pack_lane_dense(
        [d], n, pad_value=_PAD_NEG, tile_m_max=tile_m_max)

    out_block = pl.BlockSpec((None, _SUBLANES, _LANES), lambda c, j: (c, 0, 0))
    h_sums, p_sums = pl.pallas_call(
        _mi_stats_kernel,
        out_shape=(
            jax.ShapeDtypeStruct((n_splits, _SUBLANES, _LANES), jnp.float32),
            jax.ShapeDtypeStruct((n_splits, _SUBLANES, _LANES), jnp.float32)),
        grid=(n_splits, tiles_per_split),
        in_specs=[pl.BlockSpec((tile_m, _LANES),
                               lambda c, j: (c * tiles_per_split + j, 0))],
        out_specs=(out_block, out_block),
        compiler_params=pltpu.CompilerParams(
            dimension_semantics=("parallel", "arbitrary"),
            vmem_limit_bytes=32 * 1024 * 1024),
    )(d_p)

    condi_entropy = jnp.sum(h_sums) / n
    p1_mean = jnp.sum(p_sums) / n
    y_dis = jnp.stack([1.0 - p1_mean, p1_mean])
    y_dis = jnp.clip(y_dis, 1e-12, 1.0)               # guard log(0) -> NaN
    y_entropy = -jnp.sum(y_dis * jnp.log(y_dis))
    # TODO(synk): PyTorch branches on y_entropy.item() on the host; here the branch
    # is a traced jnp.where (same value, no host sync / data-dependent Python branch).
    entropy_loss = jnp.where(y_entropy < mi_threshold,
                             -y_entropy + condi_entropy, condi_entropy)
    return entropy_loss, y_entropy


# --------------------------------- InfoNCE ----------------------------------

def _infonce_kernel(z1_ref, z2_ref, out_ref, *, inv_temperature, hidden_norm):
    z1 = z1_ref[...].astype(jnp.float32)              # (B, D)
    z2 = z2_ref[...].astype(jnp.float32)
    if hidden_norm:
        z1 = z1 * jax.lax.rsqrt(jnp.sum(z1 * z1, axis=-1, keepdims=True) + 1e-24)
        z2 = z2 * jax.lax.rsqrt(jnp.sum(z2 * z2, axis=-1, keepdims=True) + 1e-24)
    z = jnp.concatenate([z1, z2], axis=0)             # (2B, D)
    zb = z.astype(jnp.bfloat16)                       # native MXU dtype
    cov = jax.lax.dot_general(zb, zb, (((1,), (1,)), ((), ())),
                              preferred_element_type=jnp.float32)   # (2B, 2B)
    sim = jnp.exp(cov * inv_temperature)
    # Remove the diagonal by subtraction (no (2B,2B) iota mask): diag logit is
    # ||z_i||^2 (== 1 when hidden_norm), computed from the same bf16 inputs.
    zbf = zb.astype(jnp.float32)
    diag = jnp.sum(zbf * zbf, axis=-1, keepdims=True)                # (2B, 1)
    neg = jnp.sum(sim, axis=-1, keepdims=True) - jnp.exp(diag * inv_temperature)
    # Positives: use the logit directly (log(exp(x)) == x), f32 for accuracy.
    pos_logit = jnp.sum(z1 * z2, axis=-1, keepdims=True) * inv_temperature  # (B, 1)
    loss = jnp.mean(jnp.log(neg)) - jnp.mean(pos_logit)
    out_ref[...] = jnp.broadcast_to(loss, out_ref.shape).astype(jnp.float32)


def infonce_stacked_pallas(z1s, z2s, temperature, hidden_norm=True):
    """z1s, z2s: (G, B, D) stacked view pairs -> (G,) per-pair InfoNCE losses.
    One pallas_call; the G axis is 'parallel' (sharded across TensorCores on v7x)."""
    g, b, d = z1s.shape
    out = pl.pallas_call(
        functools.partial(_infonce_kernel,
                          inv_temperature=1.0 / temperature,
                          hidden_norm=hidden_norm),
        out_shape=jax.ShapeDtypeStruct((g, _SUBLANES, _LANES), jnp.float32),
        grid=(g,),
        in_specs=[pl.BlockSpec((None, b, d), lambda i: (i, 0, 0)),
                  pl.BlockSpec((None, b, d), lambda i: (i, 0, 0))],
        out_specs=pl.BlockSpec((None, _SUBLANES, _LANES), lambda i: (i, 0, 0)),
        compiler_params=pltpu.CompilerParams(
            dimension_semantics=("parallel",)),
    )(z1s, z2s)
    # TODO(synk): for 2B >~ 1-2k (esp. v7x with 64 MiB VMEM) switch to a row-block
    # tiled variant (grid over 256-row tiles of z, per-row sums accumulated across
    # column tiles) instead of materializing the whole (2B,2B) sim in one block.
    return out[:, 0, 0]


# ------------------------------ module wrapper -------------------------------

class DomainAwareContrastiveDALossWithMIMax:
    """JAX/Pallas port of domain_aware_contrastive_da_loss_with_MI_maximization."""

    def __init__(self, temperature=0.5, mi_threshold=0.5):
        # TODO(synk): args.temperature_scheduler is taken as a static float here.
        self.temperature = float(temperature)
        self.mi_threshold = float(mi_threshold)

    def __call__(self, z1_src, z2_src, z1_tgt, z2_tgt, logits, labels, weight=1.0):
        if labels is not None:
            cls_loss = cross_entropy_2class_pallas(logits[0], labels)
        else:
            cls_loss = jnp.float32(0.0)

        pairs = []
        if z1_src is not None and z2_src is not None:
            pairs.append((z1_src, z2_src))
        if z1_tgt is not None and z2_tgt is not None:
            pairs.append((z1_tgt, z2_tgt))
        if not pairs:
            contrast_loss = jnp.float32(0.0)
        elif len({(p[0].shape, p[1].shape) for p in pairs}) == 1:
            z1s = jnp.stack([p[0] for p in pairs], axis=0)
            z2s = jnp.stack([p[1] for p in pairs], axis=0)
            contrast_loss = jnp.sum(
                infonce_stacked_pallas(z1s, z2s, self.temperature))
        else:  # differently-shaped src/tgt batches: fall back to separate calls
            contrast_loss = sum(
                infonce_stacked_pallas(p0[None], p1[None], self.temperature)[0]
                for p0, p1 in pairs)

        if len(logits) > 1:
            rest = jnp.concatenate(
                [l.reshape(-1, l.shape[-1]) for l in logits[1:]], axis=0)
            entropy_loss, y_entropy = neg_mutual_information_pallas(
                rest, self.mi_threshold)
        else:
            entropy_loss, y_entropy = jnp.float32(0.0), jnp.float32(0.0)

        total = cls_loss + weight * contrast_loss + entropy_loss
        return total, contrast_loss, cls_loss, entropy_loss, y_entropy


# ------------------------------ pure-JAX reference ---------------------------

def _ref_cross_entropy(logits, labels):
    x = logits.reshape(-1, logits.shape[-1]).astype(jnp.float32)
    lab = labels.reshape(-1)
    logp = jax.nn.log_softmax(x, axis=-1)
    return -jnp.mean(jnp.take_along_axis(logp, lab[:, None], axis=-1))


def _ref_infonce(z1, z2, temperature, hidden_norm=True):
    z1 = z1.astype(jnp.float32)
    z2 = z2.astype(jnp.float32)
    if hidden_norm:
        z1 = z1 / jnp.maximum(jnp.linalg.norm(z1, axis=-1, keepdims=True), 1e-12)
        z2 = z2 / jnp.maximum(jnp.linalg.norm(z2, axis=-1, keepdims=True), 1e-12)
    z = jnp.concatenate([z1, z2], axis=0)
    n = z.shape[0]
    cov = jnp.matmul(z, z.T)
    sim = jnp.exp(cov / temperature)
    mask = ~jnp.eye(n, dtype=bool)
    neg = jnp.sum(jnp.where(mask, sim, 0.0), axis=-1)
    pos = jnp.exp(jnp.sum(z1 * z2, axis=-1) / temperature)
    pos = jnp.concatenate([pos, pos], axis=0)
    return -jnp.mean(jnp.log(pos / neg))


def _ref_neg_mi(logits, threshold):
    x = logits.reshape(-1, logits.shape[-1]).astype(jnp.float32)
    p = jax.nn.softmax(x, axis=-1)
    condi = jnp.mean(-jnp.sum(p * jnp.log(p), axis=-1))
    y_dis = jnp.mean(p, axis=0)
    y_ent = -jnp.sum(y_dis * jnp.log(y_dis))
    ent_loss = jnp.where(y_ent < threshold, -y_ent + condi, condi)
    return ent_loss, y_ent


def _ref_forward(z1_src, z2_src, z1_tgt, z2_tgt, logits, labels, weight,
                 temperature, mi_threshold):
    cls = _ref_cross_entropy(logits[0], labels)
    c1 = _ref_infonce(z1_src, z2_src, temperature)
    c2 = _ref_infonce(z1_tgt, z2_tgt, temperature)
    contrast = c1 + c2
    rest = jnp.concatenate([l.reshape(-1, l.shape[-1]) for l in logits[1:]], axis=0)
    ent, y_ent = _ref_neg_mi(rest, mi_threshold)
    total = cls + weight * contrast + ent
    return total, contrast, cls, ent, y_ent


if __name__ == "__main__":
    key = jax.random.PRNGKey(0)
    ks = jax.random.split(key, 7)

    B, D = 16, 32           # contrastive feature batches
    N_CLS, N_TGT = 96, 80   # 2-class logits rows (not multiples of 128 -> padded tail)

    z1_src = jax.random.normal(ks[0], (B, D), dtype=jnp.float32)
    z2_src = jax.random.normal(ks[1], (B, D), dtype=jnp.float32)
    z1_tgt = jax.random.normal(ks[2], (B, D), dtype=jnp.float32)
    z2_tgt = jax.random.normal(ks[3], (B, D), dtype=jnp.float32)
    logits0 = jax.random.normal(ks[4], (N_CLS, 2), dtype=jnp.float32)
    logits1 = jax.random.normal(ks[5], (N_TGT, 2), dtype=jnp.float32)
    labels = jax.random.randint(ks[6], (N_CLS,), 0, 2, dtype=jnp.int32)

    temperature, mi_threshold, weight = 0.5, 0.5, 0.7
    loss_mod = DomainAwareContrastiveDALossWithMIMax(temperature, mi_threshold)

    outs = loss_mod(z1_src, z2_src, z1_tgt, z2_tgt, (logits0, logits1),
                    labels, weight)
    outs = jax.block_until_ready(outs)

    refs = _ref_forward(z1_src, z2_src, z1_tgt, z2_tgt, (logits0, logits1),
                        labels, weight, temperature, mi_threshold)
    refs = jax.block_until_ready(refs)

    names = ("total", "contrast", "cls", "entropy", "y_entropy")
    # contrast/total: bf16 MXU gram vs f32 XLA reference; entropy terms: EUP
    # approximate reciprocal -> slightly looser tolerances than the f32 cls term.
    tols = (5e-3, 3e-3, 1e-5, 5e-3, 5e-3)
    for name, got, want, tol in zip(names, outs, refs, tols):
        assert jnp.allclose(got, want, atol=tol, rtol=tol), (name, got, want)

    print("KERNEL_OK")
</pallas_src>

<mosaic_0001>
module attributes {stable_mosaic.version = 11 : i64} {
  func.func @_ce2_kernel(%arg0: i32, %arg1: i32, %arg2: memref<8x128xf32, #tpu.memory_space<vmem>>, %arg3: memref<1x8x128xf32, #tpu.memory_space<vmem>>) attributes {dimension_semantics = [#tpu.dimension_semantics<parallel>, #tpu.dimension_semantics<arbitrary>], iteration_bounds = array<i64: 1, 1>, scalar_prefetch = 0 : i64, scratch_operands = 0 : i64, tpu.core_type = #tpu.core_type<tc>, window_params = [{transform_indices = @transform_0, window_bounds = array<i64: 8, 128>}, {transform_indices = @transform_1, window_bounds = array<i64: 1, 8, 128>}]} {
    %c0_i32 = arith.constant 0 : i32
    %0 = arith.cmpi eq, %arg1, %c0_i32 : i32
    %1 = arith.extui %0 : i1 to i32
    %c0_i32_0 = arith.constant 0 : i32
    %2 = arith.cmpi ne, %1, %c0_i32_0 : i32
    scf.if %2 {
      %cst_11 = arith.constant 0.000000e+00 : f32
      %22 = vector.broadcast %cst_11 : f32 to vector<8x128xf32>
      %c0_12 = arith.constant 0 : index
      %c0_13 = arith.constant 0 : index
      %c0_14 = arith.constant 0 : index
      %23 = vector.load %arg3[%c0_12, %c0_13, %c0_14] : memref<1x8x128xf32, #tpu.memory_space<vmem>>, vector<1x8x128xf32>
      %24 = vector.shape_cast %23 : vector<1x8x128xf32> to vector<8x128xf32>
      %25 = vector.shape_cast %22 : vector<8x128xf32> to vector<1x8x128xf32>
      tpu.vector_store %arg3[%c0_12, %c0_13, %c0_14], %25 {strides = array<i32>} : memref<1x8x128xf32, #tpu.memory_space<vmem>>, vector<1x8x128xf32>,
    } else {
    }
    %c0 = arith.constant 0 : index
    %c0_1 = arith.constant 0 : index
    %3 = vector.load %arg2[%c0, %c0_1] : memref<8x128xf32, #tpu.memory_space<vmem>>, vector<8x128xf32>
    %cst = arith.constant 0.000000e+00 : f32
    %4 = vector.broadcast %cst : f32 to vector<8x128xf32>
    %5 = arith.maximumf %3, %4 : vector<8x128xf32>
    %6 = math.absf %3 : vector<8x128xf32>
    %cst_2 = arith.constant 0.000000e+00 : f32
    %7 = vector.broadcast %cst_2 : f32 to vector<8x128xf32>
    %8 = arith.subf %7, %6 : vector<8x128xf32>
    %9 = math.exp %8 : vector<8x128xf32>
    %cst_3 = arith.constant 1.000000e+00 : f32
    %10 = vector.broadcast %cst_3 : f32 to vector<8x128xf32>
    %11 = arith.addf %10, %9 : vector<8x128xf32>
    %12 = math.log %11 : vector<8x128xf32>
    %13 = arith.addf %5, %12 : vector<8x128xf32>
    %c0_4 = arith.constant 0 : index
    %c0_5 = arith.constant 0 : index
    %c0_6 = arith.constant 0 : index
    %14 = vector.load %arg3[%c0_4, %c0_5, %c0_6] : memref<1x8x128xf32, #tpu.memory_space<vmem>>, vector<1x8x128xf32>
    %15 = vector.shape_cast %14 : vector<1x8x128xf32> to vector<8x128xf32>
    %16 = vector.shape_cast %13 : vector<8x128xf32> to vector<1x8x128xf32>
    %cst_7 = arith.constant dense<0.000000e+00> : vector<8x128xf32>
    %17 = vector.multi_reduction <add>, %16, %cst_7 [0] : vector<1x8x128xf32> to vector<8x128xf32>
    %18 = arith.addf %15, %17 : vector<8x128xf32>
    %c0_8 = arith.constant 0 : index
    %c0_9 = arith.constant 0 : index
    %c0_10 = arith.constant 0 : index
    %19 = vector.load %arg3[%c0_8, %c0_9, %c0_10] : memref<1x8x128xf32, #tpu.memory_space<vmem>>, vector<1x8x128xf32>
    %20 = vector.shape_cast %19 : vector<1x8x128xf32> to vector<8x128xf32>
    %21 = vector.shape_cast %18 : vector<8x128xf32> to vector<1x8x128xf32>
    tpu.vector_store %arg3[%c0_8, %c0_9, %c0_10], %21 {strides = array<i32>} : memref<1x8x128xf32, #tpu.memory_space<vmem>>, vector<1x8x128xf32>,
    return
  }
  func.func @transform_0(%arg0: i32, %arg1: i32) -> (i32, i32) {
    %c1_i32 = arith.constant 1 : i32
    %0 = arith.muli %arg0, %c1_i32 : i32
    %1 = arith.addi %0, %arg1 : i32
    %c0_i32 = arith.constant 0 : i32
    %c0_i32_0 = arith.constant 0 : i32
    return %1, %c0_i32 : i32, i32
  }
  func.func @transform_1(%arg0: i32, %arg1: i32) -> (i32, i32, i32) {
    %c0_i32 = arith.constant 0 : i32
    %c0_i32_0 = arith.constant 0 : i32
    %c0_i32_1 = arith.constant 0 : i32
    return %arg0, %c0_i32, %c0_i32_0 : i32, i32, i32
  }
}

</mosaic_0001>

<bundles_post_ra>
// kernel: tpu_custom_call.1
= control target key start
LH: loop header
LB: loop body
LE: loop exit
PB: predicated region body
PF: predicated region fallthrough
CT: control target
= control target key end

     0   :  { %6 = vsyncpa [#allocation3], 0  ;;  %s150_s0 = inlined_call_operand.hbm [shape: f32[8,128], index: 0, kind: input, shape index: {}]   ;;  %s151_s1 = inlined_call_operand.hbm [shape: f32[1,8,128], index: 1, kind: output, shape index: {}]  }
   0x1   :  { %7 = vsyncpa [#allocation4], 0  ;;  %s114_s6 = smov [#allocation2]   ;;  %s66_s10 = scalar_lea.hbm %s150_s0, 128 }
   0x2   :  { %s17_s7 = sshll.u32 %s114_s6, 4  ;;  %p67_p0 = scmp.ne.s32.totalorder %s150_s0, %s66_s10  ;;  %s18_s7 = int_to_ptr.vmem [resolvable:$true] %s17_s7 }
   0x3   :  { %p70_p1 = scmp.lt.u32.totalorder %s66_s10, %s150_s0 }
   0x5   :  { %p72_p2 = pnand %p70_p1, %p67_p0 }
   0x7   :  { %75 = shalt.err (!%p72_p2)
}
   0x8   :  { %s76_s15 = scalar_lea.vmem %s18_s7, 128  ;;  %p81_p4 = scmp.lt.s32.totalorder %s18_s7, %s18_s7 }
   0x9   :  { %p77_p3 = scmp.ne.s32.totalorder %s18_s7, %s76_s15  ;;  %p82_p5 = scmp.lt.s32.totalorder %s76_s15, %s76_s15 }
   0xb   :  { %p83_p6 = por %p82_p5, %p81_p4 }
   0xd   :  { %p84_p7 = pnand %p83_p6, %p77_p3 }
   0xf   :  { %87 = shalt.err (!%p84_p7)
}
  0x10   :  { %20 = dma.hbm_to_vmem [thread:$0]  %s150_s0, 128, %s18_s7, [#allocation3]  }
  0x11   :  { %110 = dma.done.wait [#allocation3], 128  }
  0x12   :  { %111 = vsyncadd [#allocation3], 4294967168  ;;  %v30_v0 = vld [vmem:[#allocation2] sm:$0xff]  ;;  %s115_s18 = smov [#allocation5]  }
  0x13   :  { %v32_v1 = vand.u32 2147483647, %v30_v0  ;;  %v31_v6 = vmax.f32 %v30_v0, 0.0  ;;  %s50_s19 = sshll.u32 %s115_s18, 4  ;;  %s51_s19 = int_to_ptr.vmem [resolvable:$true] %s50_s19 }
  0x14   :  { %s88_s20 = scalar_lea.vmem %s51_s19, 128  ;;  %p93_p9 = scmp.lt.s32.totalorder %s51_s19, %s51_s19 }
  0x15   :  { %v33_v2 = vsub.f32 0.0, %v32_v1  ;;  %p89_p8 = scmp.ne.s32.totalorder %s51_s19, %s88_s20  ;;  %p94_p10 = scmp.lt.s32.totalorder %s88_s20, %s88_s20 }
  0x17   :  { %v34_v3 = vmul.f32 1.442695, %v33_v2  ;;  %p95_p11 = por %p94_p10, %p93_p9 }
  0x19   :  { %62 = vpow2.f32 %v34_v3  ;;  %p96_p12 = pnand %p95_p11, %p89_p8 }
  0x23   :  { %v63_v4 = vpop.eup %62 }
  0x24   :  { %v36_v5 = vadd.f32 1.0, %v63_v4 }
  0x26   :  { %64 = vlog2.f32 %v36_v5 }
  0x30   :  { %v65_v7 = vpop.eup %64 }
  0x31   :  { %v38_v8 = vmul.f32 0.6931472, %v65_v7 }
  0x33   :  { %v39_v9 = vadd.f32 %v38_v8, %v31_v6 }
  0x35   :  { %43 = vst [vmem:[#allocation5] sm:$0xff] %v39_v9 }
  0x36   :  { %99 = shalt.err (!%p96_p12)
}
  0x37   :  { %s100_s22 = scalar_lea.hbm %s151_s1, 128 }
  0x38   :  { %p101_p13 = scmp.ne.s32.totalorder %s151_s1, %s100_s22  ;;  %p104_p0 = scmp.lt.u32.totalorder %s100_s22, %s151_s1 }
  0x3a   :  { %p106_p1 = pnand %p104_p0, %p101_p13 }
  0x3c   :  { %109 = shalt.err (!%p106_p1)
}
  0x3d   :  { %53 = dma.vmem_to_hbm [thread:$0]  %s51_s19, 128, %s151_s1, [#allocation4]  }
  0x3e   :  { %112 = dma.done.wait [#allocation4], 128  }
  0x3f   :  { %113 = vsyncadd [#allocation4], 4294967168 }
  0x40   :  { %57 = vsyncpa [#allocation3], 1 }
  0x41   :  { %58 = vsyncpa [#allocation4], 1 }

</bundles_post_ra>
